<compile_context>
chip_gen: v7x
topology: tpu7x:2x2x1
jax: 0.10.0
libtpu: 0.0.40
codegen_flags: <defaults>
</compile_context>

<pallas_src>
import jax
import jax.numpy as jnp
from jax import lax
from jax.experimental import pallas as pl
from jax.experimental.pallas import tpu as pltpu

BN_EPS = 1e-5
_SUBLANE = 8   # round the merged parameter block's row count to a sublane multiple


def _param_rows(c):
    # w1 (c rows) + w2 (c rows) + gamma/beta/b2 (3 rows), sublane-aligned.
    return ((2 * c + 3 + _SUBLANE - 1) // _SUBLANE) * _SUBLANE


def _rtic_gating_kernel(x_ref, p_ref, o_ref):
    """Fused forward for one (B, C) instance.

    p_ref (P, C) merged parameter layout:
      rows [0,  C)  : Linear-1 weight, (in, out) layout (i.e. weight.T)
      rows [C, 2C)  : Linear-2 weight, (in, out) layout
      row   2C      : BN gamma
      row   2C + 1  : BN beta
      row   2C + 2  : Linear-2 bias
    Linear-1's bias is intentionally absent: training-mode BatchNorm subtracts
    the batch mean right after, so any per-column constant cancels exactly.
    """
    C = o_ref.shape[-1]
    x = x_ref[...]
    w1 = p_ref[0:C, :]
    w2 = p_ref[C:2 * C, :]
    gamma = p_ref[2 * C:2 * C + 1, :]
    beta = p_ref[2 * C + 1:2 * C + 2, :]
    b2 = p_ref[2 * C + 2:2 * C + 3, :]

    # Linear 1 (bias elided; see docstring).
    h = jnp.dot(x, w1, preferred_element_type=jnp.float32)

    # BatchNorm1d, training-mode (biased) batch statistics.  Two-pass variance,
    # normalization folded into a single FMA on the (B, C) tile.
    mean = jnp.mean(h, axis=0, keepdims=True)            # (1, C)
    hc = h - mean                                        # (B, C)
    var = jnp.mean(hc * hc, axis=0, keepdims=True)       # (1, C)
    scale = gamma * lax.rsqrt(var + BN_EPS)              # (1, C)
    h = hc * scale + beta                                # (B, C)

    # act_fn = ReLU.
    h = jnp.maximum(h, 0.0)

    # Linear 2, then sigmoid via one EUP tanh: sigmoid(y) = 0.5*(tanh(y/2)+1).
    y = jnp.dot(h, w2, preferred_element_type=jnp.float32) + b2
    o_ref[...] = (0.5 * jnp.tanh(0.5 * y) + 0.5).astype(o_ref.dtype)


def rtic_gating_forward(x, packed, *, out_dtype=jnp.float32):
    """Fused gating forward.

    x:      (B, C) for a single instance, or (N, B, C) for N independent
            instances fused into one pallas_call (grid over the instance axis).
    packed: (P, C) or (N, P, C) matching x, from init_params()["packed"].
    """
    # TODO(synk): for large B, add a batch-tiled grid (>=512-row x C tiles,
    # weight/param index_map constant across batch tiles so they stay
    # VMEM-resident) with a two-pass BN reduction axis placed last in the grid.
    if x.ndim == 2:
        B, C = x.shape
        P = packed.shape[0]
        assert packed.shape == (P, C)
        full = lambda shape: pl.BlockSpec(shape, lambda: (0,) * len(shape))
        return pl.pallas_call(
            _rtic_gating_kernel,
            out_shape=jax.ShapeDtypeStruct((B, C), out_dtype),
            in_specs=[full((B, C)), full((P, C))],
            out_specs=full((B, C)),
        )(x, packed)

    # Stacked path: one launch amortized over N independent instances; the
    # instance axis is a "parallel" grid dim so v7x shards it across both TCs.
    N, B, C = x.shape
    P = packed.shape[1]
    assert packed.shape == (N, P, C)
    inst = lambda rows: pl.BlockSpec((pl.Squeezed(), rows, C),
                                     lambda i: (i, 0, 0))
    return pl.pallas_call(
        _rtic_gating_kernel,
        out_shape=jax.ShapeDtypeStruct((N, B, C), out_dtype),
        grid=(N,),
        in_specs=[inst(B), inst(P)],
        out_specs=inst(B),
        compiler_params=pltpu.CompilerParams(
            dimension_semantics=("parallel",)),
    )(x, packed)


def init_params(key, in_c_img):
    """PyTorch-default init, laid out as one merged (P, C) parameter block.

    Linear: weight (out, in) ~ U(-1/sqrt(in), 1/sqrt(in)); bias likewise.
    BatchNorm1d: gamma = 1, beta = 0.
    Linear-1's bias is generated (for RNG / reference parity) but NOT packed:
    training-mode BN cancels it exactly.
    """
    C = in_c_img
    P = _param_rows(C)
    k1, k2, k3, k4 = jax.random.split(key, 4)
    bound = 1.0 / (C ** 0.5)
    u = lambda k, shape: jax.random.uniform(
        k, shape, jnp.float32, minval=-bound, maxval=bound)

    w1 = u(k1, (C, C)).T          # (in, out)
    b1 = u(k2, (1, C))
    w2 = u(k3, (C, C)).T
    b2 = u(k4, (1, C))
    gamma = jnp.ones((1, C), jnp.float32)
    beta = jnp.zeros((1, C), jnp.float32)

    # TODO(synk): if C/B grow, pre-cast w1/w2 to bf16 here (and cast x/h before
    # the matmuls, keeping f32 accumulation) to halve weight DMA bytes and use
    # single MXU passes; keep BN / ReLU / sigmoid math in f32 (no bf16 VPU/EUP
    # on v5e).
    packed = jnp.zeros((P, C), jnp.float32)
    packed = packed.at[0:C].set(w1)
    packed = packed.at[C:2 * C].set(w2)
    packed = packed.at[2 * C].set(gamma[0])
    packed = packed.at[2 * C + 1].set(beta[0])
    packed = packed.at[2 * C + 2].set(b2[0])

    return dict(
        packed=packed,
        # Unpadded originals, used only by the pure-JAX reference.
        _ref=dict(w1=w1, b1=b1, gamma=gamma, beta=beta, w2=w2, b2=b2),
    )


def _reference(x, ref):
    """Pure-JAX reference matching the PyTorch module (incl. Linear-1 bias)."""
    h = x @ ref["w1"] + ref["b1"]
    mean = h.mean(axis=0, keepdims=True)
    var = ((h - mean) ** 2).mean(axis=0, keepdims=True)
    h = (h - mean) / jnp.sqrt(var + BN_EPS) * ref["gamma"] + ref["beta"]
    h = jnp.maximum(h, 0.0)
    y = h @ ref["w2"] + ref["b2"]
    return jax.nn.sigmoid(y)


if __name__ == "__main__":
    B, C = 8, 32          # batch = 8, in_c_img = 32
    key = jax.random.PRNGKey(0)
    kx, kp = jax.random.split(key)
    x = jax.random.normal(kx, (B, C), jnp.float32)
    params = init_params(kp, C)

    # Single-instance path.
    out = rtic_gating_forward(x, params["packed"])
    out = jax.block_until_ready(out)
    ref = _reference(x, params["_ref"])
    assert out.shape == (B, C)
    assert jnp.max(jnp.abs(out - ref)) < 1e-4, "single-instance mismatch"

    # Multi-instance path: N independent gating modules in one launch.
    N = 4
    xs = jax.random.normal(jax.random.PRNGKey(1), (N, B, C), jnp.float32)
    inst_keys = jax.random.split(jax.random.PRNGKey(2), N)
    inst_params = [init_params(k, C) for k in inst_keys]
    packed_stack = jnp.stack([p["packed"] for p in inst_params])
    outs = rtic_gating_forward(xs, packed_stack)
    outs = jax.block_until_ready(outs)
    assert outs.shape == (N, B, C)
    for n in range(N):
        refn = _reference(xs[n], inst_params[n]["_ref"])
        assert jnp.max(jnp.abs(outs[n] - refn)) < 1e-4, f"instance {n} mismatch"

    print("KERNEL_OK")
</pallas_src>

<mosaic_0001>
module attributes {stable_mosaic.version = 11 : i64} {
  func.func @_rtic_gating_kernel(%arg0: memref<8x32xf32, #tpu.memory_space<vmem>>, %arg1: memref<72x32xf32, #tpu.memory_space<vmem>>, %arg2: memref<8x32xf32, #tpu.memory_space<vmem>>) attributes {dimension_semantics = [], scalar_prefetch = 0 : i64, scratch_operands = 0 : i64, tpu.core_type = #tpu.core_type<tc>} {
    %c0 = arith.constant 0 : index
    %c0_0 = arith.constant 0 : index
    %0 = vector.load %arg0[%c0, %c0_0] : memref<8x32xf32, #tpu.memory_space<vmem>>, vector<8x32xf32>
    %c0_1 = arith.constant 0 : index
    %c0_2 = arith.constant 0 : index
    %1 = vector.load %arg1[%c0_1, %c0_2] : memref<72x32xf32, #tpu.memory_space<vmem>>, vector<32x32xf32>
    %c32 = arith.constant 32 : index
    %c0_3 = arith.constant 0 : index
    %2 = vector.load %arg1[%c32, %c0_3] : memref<72x32xf32, #tpu.memory_space<vmem>>, vector<32x32xf32>
    %c64 = arith.constant 64 : index
    %c0_4 = arith.constant 0 : index
    %3 = vector.load %arg1[%c64, %c0_4] : memref<72x32xf32, #tpu.memory_space<vmem>>, vector<1x32xf32>
    %c65 = arith.constant 65 : index
    %c0_5 = arith.constant 0 : index
    %4 = vector.load %arg1[%c65, %c0_5] : memref<72x32xf32, #tpu.memory_space<vmem>>, vector<1x32xf32>
    %c66 = arith.constant 66 : index
    %c0_6 = arith.constant 0 : index
    %5 = vector.load %arg1[%c66, %c0_6] : memref<72x32xf32, #tpu.memory_space<vmem>>, vector<1x32xf32>
    %cst = arith.constant dense<0.000000e+00> : vector<8x32xf32>
    %6 = tpu.matmul %0, %1, %cst {dimension_numbers = #tpu.dot_dimension_numbers<[1], [0], [0], [1], [0, 0, 1, 1], [], []>} : vector<8x32xf32>, vector<32x32xf32>, vector<8x32xf32> -> vector<8x32xf32>
    %cst_7 = arith.constant dense<0.000000e+00> : vector<32xf32>
    %7 = vector.multi_reduction <add>, %6, %cst_7 [0] : vector<8x32xf32> to vector<32xf32>
    %8 = vector.shape_cast %7 : vector<32xf32> to vector<1x32xf32>
    %cst_8 = arith.constant 8.000000e+00 : f32
    %9 = vector.broadcast %cst_8 : f32 to vector<1x32xf32>
    %10 = arith.divf %8, %9 : vector<1x32xf32>
    %11 = vector.broadcast %10 : vector<1x32xf32> to vector<8x32xf32>
    %12 = arith.subf %6, %11 : vector<8x32xf32>
    %13 = arith.mulf %12, %12 : vector<8x32xf32>
    %cst_9 = arith.constant dense<0.000000e+00> : vector<32xf32>
    %14 = vector.multi_reduction <add>, %13, %cst_9 [0] : vector<8x32xf32> to vector<32xf32>
    %15 = vector.shape_cast %14 : vector<32xf32> to vector<1x32xf32>
    %cst_10 = arith.constant 8.000000e+00 : f32
    %16 = vector.broadcast %cst_10 : f32 to vector<1x32xf32>
    %17 = arith.divf %15, %16 : vector<1x32xf32>
    %cst_11 = arith.constant 9.99999974E-6 : f32
    %18 = vector.broadcast %cst_11 : f32 to vector<1x32xf32>
    %19 = arith.addf %17, %18 : vector<1x32xf32>
    %20 = math.rsqrt %19 : vector<1x32xf32>
    %21 = arith.mulf %3, %20 : vector<1x32xf32>
    %22 = vector.broadcast %21 : vector<1x32xf32> to vector<8x32xf32>
    %23 = arith.mulf %12, %22 : vector<8x32xf32>
    %24 = vector.broadcast %4 : vector<1x32xf32> to vector<8x32xf32>
    %25 = arith.addf %23, %24 : vector<8x32xf32>
    %cst_12 = arith.constant 0.000000e+00 : f32
    %26 = vector.broadcast %cst_12 : f32 to vector<8x32xf32>
    %27 = arith.maximumf %25, %26 : vector<8x32xf32>
    %cst_13 = arith.constant dense<0.000000e+00> : vector<8x32xf32>
    %28 = tpu.matmul %27, %2, %cst_13 {dimension_numbers = #tpu.dot_dimension_numbers<[1], [0], [0], [1], [0, 0, 1, 1], [], []>} : vector<8x32xf32>, vector<32x32xf32>, vector<8x32xf32> -> vector<8x32xf32>
    %29 = vector.broadcast %5 : vector<1x32xf32> to vector<8x32xf32>
    %30 = arith.addf %28, %29 : vector<8x32xf32>
    %cst_14 = arith.constant 5.000000e-01 : f32
    %31 = vector.broadcast %cst_14 : f32 to vector<8x32xf32>
    %32 = arith.mulf %31, %30 : vector<8x32xf32>
    %33 = math.tanh %32 : vector<8x32xf32>
    %cst_15 = arith.constant 5.000000e-01 : f32
    %34 = vector.broadcast %cst_15 : f32 to vector<8x32xf32>
    %35 = arith.mulf %34, %33 : vector<8x32xf32>
    %cst_16 = arith.constant 5.000000e-01 : f32
    %36 = vector.broadcast %cst_16 : f32 to vector<8x32xf32>
    %37 = arith.addf %35, %36 : vector<8x32xf32>
    %c0_17 = arith.constant 0 : index
    %c0_18 = arith.constant 0 : index
    %38 = vector.load %arg2[%c0_17, %c0_18] : memref<8x32xf32, #tpu.memory_space<vmem>>, vector<8x32xf32>
    tpu.vector_store %arg2[%c0_17, %c0_18], %37 {strides = array<i32>} : memref<8x32xf32, #tpu.memory_space<vmem>>, vector<8x32xf32>,
    return
  }
}

</mosaic_0001>

<bundles_post_ra>
// kernel: tpu_custom_call.1
= control target key start
LH: loop header
LB: loop body
LE: loop exit
PB: predicated region body
PF: predicated region fallthrough
CT: control target
= control target key end

     0   :  { %v307_v3 = vmov 0.0|0.0   ;;  %vm308_vm0 = vmmov 0   ;;  %v309_v6 = vmov 0.0   ;;  %s379_s0 = inlined_call_operand.vmem [shape: f32[8,32], index: 0, kind: input, shape index: {}]   ;;  %s380_s1 = inlined_call_operand.vmem [shape: f32[72,32], index: 1, kind: input, shape index: {}]   ;;  %s381_s2 = inlined_call_operand.hbm [shape: f32[8,32], index: 2, kind: output, shape index: {}]  }
   0x1   :  { %v13_v0 = vld [vmem:[%s380_s1] sm:$0xff]  ;;  %v14_v1 = vld [vmem:[%s380_s1 + $0x8] sm:$0xff]  ;;  %v15_v2 = vld [vmem:[%s380_s1 + $0x10] sm:$0xff]  ;;  %263 = vmatprep.subr.bf16.mxu0 %v307_v3  ;;  %249 = vmatprep.mubr.msk.f32.mxu0 %vm308_vm0, %v309_v6 }
   0x2   :  { %v264_v4 = vpack.c.bf16 %v14_v1, %v13_v0  ;;  %v16_v5 = vld [vmem:[%s380_s1 + $0x18] sm:$0xff]  ;;  %269 = vmatprep.subr.bf16.mxu1 %v307_v3  ;;  %260 = vmatprep.mubr.msk.f32.mxu1 %vm308_vm0, %v309_v6 }
   0x3   :  { %7 = vsyncpa [#allocation3], 0  ;;  %v267_v7 = vpack.c.bf16 %v16_v5, %v15_v2  ;;  %v12_v8 = vld [vmem:[%s379_s0] sm:$0xff]  ;;  %vm24_vm1 = vcmask 261120   ;;  %v18_v10 = vld [vmem:[%s380_s1 + $0x28] sm:$0xff]  ;;  %v120_v36 = vlaneseq  ;;  %s310_s4 = smov [#allocation2]  }
   0x4   :  { %265 = vmatpush3.bf16.msra.mxu0 %v264_v4  ;;  %v17_v9 = vld [vmem:[%s380_s1 + $0x20] sm:$0xff]  ;;  %v19_v12 = vld [vmem:[%s380_s1 + $0x30] sm:$0xff]  ;;  %v20_v13 = vld [vmem:[%s380_s1 + $0x38] sm:$0xff]  ;;  %s219_s5 = sshll.u32 %s310_s4, 4  ;;  %s220_s5 = int_to_ptr.vmem [resolvable:$true] %s219_s5 }
   0x5   :  { %266 = vmatprep.subr.bf16.mxu0 %v307_v3  ;;  %v270_v11 = vpack.c.bf16 %v18_v10, %v17_v9  ;;  %v273_v14 = vpack.c.bf16 %v20_v13, %v19_v12  ;;  %v121_v37 = vshrl.u32 %v120_v36, 7  ;;  %v21_v38 = vld [vmem:[%s380_s1 + $0x40] sm:$0x1]  ;;  %v228_v43 = vld [vmem:[%s380_s1 + $0x41] ss:$0 sm:$0xff]  ;;  %s283_s6 = scalar_lea.vmem %s220_s5, 128  ;;  %p288_p1 = scmp.lt.s32.totalorder %s220_s5, %s220_s5 }
   0x6   :  { %v229_v47 = vld [vmem:[%s380_s1 + $0x42] ss:$0 sm:$0xff]  ;;  %p284_p0 = scmp.ne.s32.totalorder %s220_s5, %s283_s6  ;;  %p289_p2 = scmp.lt.s32.totalorder %s283_s6, %s283_s6 }
   0x7   :  { %271 = vmatpush3.bf16.msra.mxu1 %v270_v11  ;;  %v122_v39 = vsub.s32 0, %v121_v37 }
   0x8   :  { %268 = vmatpush3.bf16.msra.mxu0 %v267_v7  ;;  %272 = vmatprep.subr.bf16.mxu1 %v307_v3  ;;  %p290_p3 = por %p289_p2, %p288_p1 }
   0xa   :  { %p291_p4 = pnand %p290_p3, %p284_p0 }
   0xb   :  { %250 = vmatmul.mubr.msk.f32.vlgmr.msra.gmra.mrb[0].mxu0 %vm24_vm1, %v12_v8  ;;  %274 = vmatpush3.bf16.msra.mxu1 %v273_v14 }
  0xde   :  { %v94_v15 = vpop.f32.mrb[0].mxu0 }
  0xdf   :  { %v98_v16 = vsel %vm24_vm1, %v94_v15, 0.0  ;;  %v251_v17 = vpop.f32.mrb[1].mxu0 }
  0xe0   :  { %v99_v18 = vrot.slane %v98_v16, 4 }
  0xe2   :  { %v100_v19 = vadd.f32 %v99_v18, %v98_v16 }
  0xe4   :  { %v101_v20 = vrot.slane %v100_v19, 2 }
  0xe6   :  { %v102_v21 = vadd.f32 %v101_v20, %v100_v19 }
  0xe8   :  { %v103_v22 = vrot.slane %v102_v21, 1 }
  0xea   :  { %v104_v23 = vadd.f32 %v103_v22, %v102_v21 }
  0xec   :  { %v106_v24 = vmul.f32 0.125, %v104_v23 }
  0xee   :  { %v107_v25 = vsub.f32 %v94_v15, %v106_v24 }
  0xf0   :  { %v108_v26 = vmul.f32 %v107_v25, %v107_v25 }
  0xf2   :  { %v109_v27 = vsel %vm24_vm1, %v108_v26, 0.0 }
  0xf3   :  { %v110_v28 = vrot.slane %v109_v27, 4 }
  0xf5   :  { %v111_v29 = vadd.f32 %v110_v28, %v109_v27 }
  0xf7   :  { %v112_v30 = vrot.slane %v111_v29, 2 }
  0xf9   :  { %v113_v31 = vadd.f32 %v112_v30, %v111_v29 }
  0xfb   :  { %v114_v32 = vrot.slane %v113_v31, 1 }
  0xfd   :  { %v115_v33 = vadd.f32 %v114_v32, %v113_v31 }
  0xff   :  { %v116_v34 = vmul.f32 0.125, %v115_v33 }
 0x101   :  { %v117_v35 = vadd.f32 1e-05, %v116_v34 }
 0x103   :  { %279 = vrsqrt.f32 %v117_v35 }
 0x10d   :  { %v280_v40 = vpop.eup %279 }
 0x10e   :  { %v119_v41 = vmul.f32 %v280_v40, %v21_v38 }
 0x110   :  { %v123_v42 = vrot.slane %v119_v41, %v122_v39 }
 0x112   :  { %v124_v44 = vmul.f32 %v123_v42, %v107_v25 }
 0x114   :  { %v129_v45 = vadd.f32 %v228_v43, %v124_v44 }
 0x116   :  { %v130_v46 = vmax.f32 %v129_v45, 0.0 }
 0x118   :  { %261 = vmatmul.mubr.msk.f32.vlgmr.msra.gmra.mrb[0].mxu1 %vm24_vm1, %v130_v46 }
 0x1eb   :  { %v204_v48 = vpop.f32.mrb[0].mxu1 }
 0x1ec   :  { %v205_v49 = vadd.f32 %v229_v47, %v204_v48  ;;  %v262_v50 = vpop.f32.mrb[1].mxu1 }
 0x1ee   :  { %v208_v51 = vmul.f32 0.5, %v205_v49 }
 0x1f0   :  { %281 = vtanh.f32 %v208_v51 }
 0x1fa   :  { %v282_v52 = vpop.eup %281 }
 0x1fb   :  { %v210_v53 = vmul.f32 0.5, %v282_v52 }
 0x1fd   :  { %v211_v54 = vadd.f32 0.5, %v210_v53 }
 0x1ff   :  { %212 = vst.msk [vmem:[#allocation2] sm:$0xff] %vm24_vm1, %v211_v54 }
 0x200   :  { %294 = shalt.err (!%p291_p4)
}
 0x201   :  { %s295_s8 = scalar_lea.hbm %s381_s2, 128 }
 0x202   :  { %p296_p5 = scmp.ne.s32.totalorder %s381_s2, %s295_s8  ;;  %p299_p6 = scmp.lt.u32.totalorder %s295_s8, %s381_s2 }
 0x204   :  { %p301_p7 = pnand %p299_p6, %p296_p5 }
 0x206   :  { %304 = shalt.err (!%p301_p7)
}
 0x207   :  { %222 = dma.vmem_to_hbm [thread:$0]  %s220_s5, 128, %s381_s2, [#allocation3]  }
 0x208   :  { %305 = dma.done.wait [#allocation3], 128  }
 0x209   :  { %306 = vsyncadd [#allocation3], 4294967168 }
 0x20a   :  { %226 = vsyncpa [#allocation3], 1 }

</bundles_post_ra>
